<compile_context>
chip_gen: v7x
topology: tpu7x:2x2x1
jax: 0.10.0
libtpu: 0.0.40
codegen_flags: <defaults>
</compile_context>

<pallas_src>
import functools
import numpy as np
import jax
import jax.numpy as jnp
from jax.experimental import pallas as pl

# ---------------- configuration (small, consistent with the module) ----------
B = 2            # batch
N = 8            # sequence length (tokens)
DIM = 32         # embedding dim
NUM_HEADS = 4
HEAD_DIM = DIM // NUM_HEADS
MLP_RATIO = 4.0
HIDDEN = int(DIM * MLP_RATIO)
LN_EPS = 1e-5    # PyTorch nn.LayerNorm default


def _layer_norm(y, gamma, beta):
    mu = jnp.mean(y, axis=-1, keepdims=True)
    var = jnp.mean(jnp.square(y - mu), axis=-1, keepdims=True)
    return (y - mu) * jax.lax.rsqrt(var + LN_EPS) * gamma + beta


def res_post_block_kernel(
    x_ref,            # (T, C)  T = B*N tokens (batch folded into rows), f32
    mask_ref,         # (H*T, T) f32 additive bias (0 within batch, -1e30 across)
    wqk_ref,          # (C, 2*H*hd) bf16 : [q heads | k heads], scale folded into q
    wvp_ref,          # (C, H*C)    bf16 : per-head Wv_h @ Wproj_h, lane-stacked
    wfc1_ref,         # (C, HID)    bf16
    wfc2_ref,         # (HID, C)    bf16
    vec_ref,          # (8, 128) f32 slab: r0=b_fc1, r1=b_proj, r2=g1, r3=be1,
                      #                    r4=b_fc2, r5=g2, r6=be2
    out_ref,          # (T, C) f32
    *, num_heads, head_dim,
):
    x = x_ref[...]                                   # (T, C) f32
    T, C = x.shape
    H, hd = num_heads, head_dim
    QW = H * hd                                      # width of the Q block in wqk

    # unpack the packed bias / LayerNorm vector slab (static row/lane slices)
    vec = vec_ref[...]
    b_fc1 = vec[0:1, :]                              # (1, HID)  HID == 128 lanes
    b_proj = vec[1:2, :C]
    g1, be1 = vec[2:3, :C], vec[3:4, :C]
    b_fc2 = vec[4:5, :C]
    g2, be2 = vec[5:6, :C], vec[6:7, :C]

    xb = x.astype(jnp.bfloat16)                      # bf16 at matmul inputs only

    # ---- fused Q/K projection: one (T,C)x(C,2*H*hd) matmul (scale pre-folded) ----
    qk = jnp.dot(xb, wqk_ref[...], preferred_element_type=jnp.float32)   # (T, 2*H*hd)
    # ---- fused value*proj projection: one 128-lane-wide matmul ------------------
    vtil = jnp.dot(xb, wvp_ref[...], preferred_element_type=jnp.float32) # (T, H*C)

    # ---- per-head scores, stacked along sublanes: (H*T, T) ----------------------
    s_rows = []
    for h in range(H):                               # static unroll, H = 4
        q_h = qk[:, h * hd:(h + 1) * hd]             # (T, hd)
        k_h = qk[:, QW + h * hd:QW + (h + 1) * hd]   # (T, hd)
        s_rows.append(jax.lax.dot_general(           # q_h @ k_h^T, no transpose op
            q_h, k_h, (((1,), (1,)), ((), ())),
            preferred_element_type=jnp.float32))     # (T, T)
    s = jnp.concatenate(s_rows, axis=0) + mask_ref[...]   # (H*T, T) + static bias

    # ---- ONE batched softmax across every (head, query) row ---------------------
    s = s - jnp.max(s, axis=-1, keepdims=True)
    p = jnp.exp(s)
    p = p * pl.reciprocal(jnp.sum(p, axis=-1, keepdims=True), approx=True)

    # ---- attn = sum_h p_h @ (x @ Wv_h @ Wproj_h)  (pairwise tree sum) -----------
    parts = [
        jnp.dot(p[h * T:(h + 1) * T, :], vtil[:, h * C:(h + 1) * C],
                preferred_element_type=jnp.float32)
        for h in range(H)
    ]
    while len(parts) > 1:
        nxt = [a + b for a, b in zip(parts[::2], parts[1::2])]
        if len(parts) % 2:
            nxt.append(parts[-1])
        parts = nxt
    attn = parts[0] + b_proj                         # (T, C)

    # residual 1: x + norm1(attn(x))
    x1 = x + _layer_norm(attn, g1, be1)

    # ---- MLP ---------------------------------------------------------------------
    h1 = jnp.dot(x1.astype(jnp.bfloat16), wfc1_ref[...],
                 preferred_element_type=jnp.float32) + b_fc1
    h1 = jax.nn.gelu(h1, approximate=True)           # tanh GELU -> EUP
    h2 = jnp.dot(h1.astype(jnp.bfloat16), wfc2_ref[...],
                 preferred_element_type=jnp.float32) + b_fc2

    # residual 2: x + norm2(mlp(x))
    out_ref[...] = (x1 + _layer_norm(h2, g2, be2)).astype(out_ref.dtype)


def res_post_block(x, kparams):
    """x: (B, N, C) float32 -> (B, N, C) float32.  Single kernel invocation, no grid."""
    Bq, Nq, Cq = x.shape
    xf = x.reshape(Bq * Nq, Cq)                      # fold batch into token rows
    out = pl.pallas_call(
        functools.partial(res_post_block_kernel,
                          num_heads=NUM_HEADS, head_dim=HEAD_DIM),
        out_shape=jax.ShapeDtypeStruct((Bq * Nq, Cq), jnp.float32),
    )(xf, *kparams)
    return out.reshape(Bq, Nq, Cq)


# ---------------- pure-JAX reference (PyTorch-faithful: exact erf GELU) -----------
def res_post_block_ref(x, tp):
    Bq, Nq, Cq = x.shape
    qkv = x @ tp["w_qkv"].T                                  # (B, N, 3C)
    qkv = qkv.reshape(Bq, Nq, 3, NUM_HEADS, HEAD_DIM).transpose(2, 0, 3, 1, 4)
    q, k, v = qkv[0], qkv[1], qkv[2]                         # (B, H, N, hd)
    s = jnp.einsum("bhqd,bhkd->bhqk", q, k) * (HEAD_DIM ** -0.5)
    p = jax.nn.softmax(s, axis=-1)
    o = jnp.einsum("bhqk,bhkd->bhqd", p, v)                  # (B, H, N, hd)
    o = o.transpose(0, 2, 1, 3).reshape(Bq, Nq, Cq)
    o = o @ tp["w_proj"].T + tp["b_proj"]
    x1 = x + _layer_norm(o, tp["g1"], tp["be1"])
    h = jax.nn.gelu(x1 @ tp["w_fc1"].T + tp["b_fc1"], approximate=False)
    h = h @ tp["w_fc2"].T + tp["b_fc2"]
    return x1 + _layer_norm(h, tp["g2"], tp["be2"])


# ---------------- deterministic parameters (torch (out, in) layout) ---------------
def make_torch_params(key):
    ks = jax.random.split(key, 11)
    w_qkv = 0.02 * jax.random.normal(ks[0], (3 * DIM, DIM), jnp.float32)  # qkv_bias=False
    w_proj = 0.02 * jax.random.normal(ks[1], (DIM, DIM), jnp.float32)
    b_proj = 0.02 * jax.random.normal(ks[2], (1, DIM), jnp.float32)
    w_fc1 = 0.02 * jax.random.normal(ks[3], (HIDDEN, DIM), jnp.float32)
    b_fc1 = 0.02 * jax.random.normal(ks[4], (1, HIDDEN), jnp.float32)
    w_fc2 = 0.02 * jax.random.normal(ks[5], (DIM, HIDDEN), jnp.float32)
    b_fc2 = 0.02 * jax.random.normal(ks[6], (1, DIM), jnp.float32)
    # init_values=None -> LayerNorm gamma~1 / beta~0 (small perturbation so the
    # packed-slab plumbing is actually exercised by the correctness check)
    g1 = 1.0 + 0.1 * jax.random.normal(ks[7], (1, DIM), jnp.float32)
    be1 = 0.05 * jax.random.normal(ks[8], (1, DIM), jnp.float32)
    g2 = 1.0 + 0.1 * jax.random.normal(ks[9], (1, DIM), jnp.float32)
    be2 = 0.05 * jax.random.normal(ks[10], (1, DIM), jnp.float32)
    return dict(w_qkv=w_qkv, w_proj=w_proj, b_proj=b_proj,
                w_fc1=w_fc1, b_fc1=b_fc1, w_fc2=w_fc2, b_fc2=b_fc2,
                g1=g1, be1=be1, g2=g2, be2=be2)


def to_kernel_params(tp):
    """One-time host-side re-layout: lane-dense fused weights, packed vector slab,
    precomputed block-diagonal attention bias, bf16 weight cast."""
    C, H, hd, HID = DIM, NUM_HEADS, HEAD_DIM, HIDDEN
    scale = hd ** -0.5
    w_qkv = tp["w_qkv"]                               # (3C, C), rows [q|k|v][head][hd]

    # fused Q/K weight, lane-stacked (C, 2*H*hd); 1/sqrt(hd) folded into Q columns
    wq = w_qkv[0 * C:1 * C].T * scale                 # (C, H*hd)
    wk = w_qkv[1 * C:2 * C].T                         # (C, H*hd)
    w_qk = jnp.concatenate([wq, wk], axis=1)          # (C, 2*H*hd) = (32, 64)

    # fold output projection into value projection: W~_h = Wv_h @ Wproj_h, (C, H*C)
    wv = w_qkv[2 * C:3 * C].T                         # (C, H*hd)
    wp = tp["w_proj"].T                               # (H*hd, C), rows [head][hd]
    w_vp = jnp.concatenate(
        [wv[:, h * hd:(h + 1) * hd] @ wp[h * hd:(h + 1) * hd, :] for h in range(H)],
        axis=1)                                       # (C, H*C) = (32, 128)

    # pack the seven small bias / LayerNorm vectors into ONE (8, 128) f32 slab
    vec = jnp.zeros((8, 128), jnp.float32)
    vec = vec.at[0, :HID].set(tp["b_fc1"][0])
    vec = vec.at[1, :C].set(tp["b_proj"][0])
    vec = vec.at[2, :C].set(tp["g1"][0])
    vec = vec.at[3, :C].set(tp["be1"][0])
    vec = vec.at[4, :C].set(tp["b_fc2"][0])
    vec = vec.at[5, :C].set(tp["g2"][0])
    vec = vec.at[6, :C].set(tp["be2"][0])

    # precomputed block-diagonal (within-batch) additive attention bias, (H*T, T)
    T = B * N
    tok = np.arange(T)
    same = (tok[:, None] // N) == (tok[None, :] // N)
    bias = np.where(same, 0.0, -1e30).astype(np.float32)     # (T, T)
    bias = jnp.asarray(np.tile(bias, (H, 1)))                # (H*T, T)

    bf16 = jnp.bfloat16
    return (bias,
            w_qk.astype(bf16),
            w_vp.astype(bf16),
            tp["w_fc1"].T.astype(bf16),               # (C, HID)
            tp["w_fc2"].T.astype(bf16),               # (HID, C)
            vec)


if __name__ == "__main__":
    key = jax.random.PRNGKey(0)
    kx, kp = jax.random.split(key)
    x = jax.random.normal(kx, (B, N, DIM), jnp.float32)
    tp = make_torch_params(kp)
    kparams = to_kernel_params(tp)

    out = jax.block_until_ready(res_post_block(x, kparams))
    ref = jax.block_until_ready(res_post_block_ref(x, tp))

    assert out.shape == (B, N, DIM)
    # Tolerance vs the exact f32/erf reference: the kernel uses bf16 weights and
    # bf16-cast matmul inputs (f32 accumulation / softmax / LayerNorm), an EUP
    # approximate reciprocal for the softmax denominator, and tanh GELU, all per
    # the perf review.  LayerNorm amplifies the tiny pre-norm branch activations,
    # so bf16 rounding shows up at the ~1e-2 level; structural bugs would be O(1).
    np.testing.assert_allclose(np.asarray(out), np.asarray(ref), atol=4e-2, rtol=4e-2)

    print("KERNEL_OK")
</pallas_src>

<mosaic_0001>
module attributes {stable_mosaic.version = 11 : i64} {
  func.func @res_post_block_kernel(%arg0: memref<16x32xf32, #tpu.memory_space<vmem>>, %arg1: memref<64x16xf32, #tpu.memory_space<vmem>>, %arg2: memref<32x64xbf16, #tpu.memory_space<vmem>>, %arg3: memref<32x128xbf16, #tpu.memory_space<vmem>>, %arg4: memref<32x128xbf16, #tpu.memory_space<vmem>>, %arg5: memref<128x32xbf16, #tpu.memory_space<vmem>>, %arg6: memref<8x128xf32, #tpu.memory_space<vmem>>, %arg7: memref<16x32xf32, #tpu.memory_space<vmem>>) attributes {dimension_semantics = [], scalar_prefetch = 0 : i64, scratch_operands = 0 : i64, tpu.core_type = #tpu.core_type<tc>} {
    %c0 = arith.constant 0 : index
    %c0_0 = arith.constant 0 : index
    %0 = vector.load %arg0[%c0, %c0_0] : memref<16x32xf32, #tpu.memory_space<vmem>>, vector<16x32xf32>
    %c0_1 = arith.constant 0 : index
    %c0_2 = arith.constant 0 : index
    %1 = vector.load %arg6[%c0_1, %c0_2] : memref<8x128xf32, #tpu.memory_space<vmem>>, vector<8x128xf32>
    %2 = vector.extract_strided_slice %1 {offsets = [0, 0], sizes = [1, 128], strides = [1, 1]} : vector<8x128xf32> to vector<1x128xf32>
    %3 = vector.extract_strided_slice %1 {offsets = [1, 0], sizes = [1, 32], strides = [1, 1]} : vector<8x128xf32> to vector<1x32xf32>
    %4 = vector.extract_strided_slice %1 {offsets = [2, 0], sizes = [1, 32], strides = [1, 1]} : vector<8x128xf32> to vector<1x32xf32>
    %5 = vector.extract_strided_slice %1 {offsets = [3, 0], sizes = [1, 32], strides = [1, 1]} : vector<8x128xf32> to vector<1x32xf32>
    %6 = vector.extract_strided_slice %1 {offsets = [4, 0], sizes = [1, 32], strides = [1, 1]} : vector<8x128xf32> to vector<1x32xf32>
    %7 = vector.extract_strided_slice %1 {offsets = [5, 0], sizes = [1, 32], strides = [1, 1]} : vector<8x128xf32> to vector<1x32xf32>
    %8 = vector.extract_strided_slice %1 {offsets = [6, 0], sizes = [1, 32], strides = [1, 1]} : vector<8x128xf32> to vector<1x32xf32>
    %9 = arith.truncf %0 : vector<16x32xf32> to vector<16x32xbf16>
    %c0_3 = arith.constant 0 : index
    %c0_4 = arith.constant 0 : index
    %10 = vector.load %arg2[%c0_3, %c0_4] : memref<32x64xbf16, #tpu.memory_space<vmem>>, vector<32x64xbf16>
    %cst = arith.constant dense<0.000000e+00> : vector<16x64xf32>
    %11 = tpu.matmul %9, %10, %cst {dimension_numbers = #tpu.dot_dimension_numbers<[1], [0], [0], [1], [0, 0, 1, 1], [], []>} : vector<16x32xbf16>, vector<32x64xbf16>, vector<16x64xf32> -> vector<16x64xf32>
    %c0_5 = arith.constant 0 : index
    %c0_6 = arith.constant 0 : index
    %12 = vector.load %arg3[%c0_5, %c0_6] : memref<32x128xbf16, #tpu.memory_space<vmem>>, vector<32x128xbf16>
    %cst_7 = arith.constant dense<0.000000e+00> : vector<16x128xf32>
    %13 = tpu.matmul %9, %12, %cst_7 {dimension_numbers = #tpu.dot_dimension_numbers<[1], [0], [0], [1], [0, 0, 1, 1], [], []>} : vector<16x32xbf16>, vector<32x128xbf16>, vector<16x128xf32> -> vector<16x128xf32>
    %14 = vector.extract_strided_slice %11 {offsets = [0, 0], sizes = [16, 8], strides = [1, 1]} : vector<16x64xf32> to vector<16x8xf32>
    %15 = vector.extract_strided_slice %11 {offsets = [0, 32], sizes = [16, 8], strides = [1, 1]} : vector<16x64xf32> to vector<16x8xf32>
    %cst_8 = arith.constant dense<0.000000e+00> : vector<16x16xf32>
    %16 = tpu.matmul %14, %15, %cst_8 {dimension_numbers = #tpu.dot_dimension_numbers<[1], [1], [0], [0], [0, 0, 1, 0], [], []>} : vector<16x8xf32>, vector<16x8xf32>, vector<16x16xf32> -> vector<16x16xf32>
    %17 = vector.extract_strided_slice %11 {offsets = [0, 8], sizes = [16, 8], strides = [1, 1]} : vector<16x64xf32> to vector<16x8xf32>
    %18 = vector.extract_strided_slice %11 {offsets = [0, 40], sizes = [16, 8], strides = [1, 1]} : vector<16x64xf32> to vector<16x8xf32>
    %cst_9 = arith.constant dense<0.000000e+00> : vector<16x16xf32>
    %19 = tpu.matmul %17, %18, %cst_9 {dimension_numbers = #tpu.dot_dimension_numbers<[1], [1], [0], [0], [0, 0, 1, 0], [], []>} : vector<16x8xf32>, vector<16x8xf32>, vector<16x16xf32> -> vector<16x16xf32>
    %20 = vector.extract_strided_slice %11 {offsets = [0, 16], sizes = [16, 8], strides = [1, 1]} : vector<16x64xf32> to vector<16x8xf32>
    %21 = vector.extract_strided_slice %11 {offsets = [0, 48], sizes = [16, 8], strides = [1, 1]} : vector<16x64xf32> to vector<16x8xf32>
    %cst_10 = arith.constant dense<0.000000e+00> : vector<16x16xf32>
    %22 = tpu.matmul %20, %21, %cst_10 {dimension_numbers = #tpu.dot_dimension_numbers<[1], [1], [0], [0], [0, 0, 1, 0], [], []>} : vector<16x8xf32>, vector<16x8xf32>, vector<16x16xf32> -> vector<16x16xf32>
    %23 = vector.extract_strided_slice %11 {offsets = [0, 24], sizes = [16, 8], strides = [1, 1]} : vector<16x64xf32> to vector<16x8xf32>
    %24 = vector.extract_strided_slice %11 {offsets = [0, 56], sizes = [16, 8], strides = [1, 1]} : vector<16x64xf32> to vector<16x8xf32>
    %cst_11 = arith.constant dense<0.000000e+00> : vector<16x16xf32>
    %25 = tpu.matmul %23, %24, %cst_11 {dimension_numbers = #tpu.dot_dimension_numbers<[1], [1], [0], [0], [0, 0, 1, 0], [], []>} : vector<16x8xf32>, vector<16x8xf32>, vector<16x16xf32> -> vector<16x16xf32>
    %26 = tpu.concatenate %16, %19, %22, %25 in 0 : vector<16x16xf32>, vector<16x16xf32>, vector<16x16xf32>, vector<16x16xf32> -> vector<64x16xf32>
    %c0_12 = arith.constant 0 : index
    %c0_13 = arith.constant 0 : index
    %27 = vector.load %arg1[%c0_12, %c0_13] : memref<64x16xf32, #tpu.memory_space<vmem>>, vector<64x16xf32>
    %28 = arith.addf %26, %27 : vector<64x16xf32>
    %cst_14 = arith.constant dense<0xFF800000> : vector<64xf32>
    %29 = vector.multi_reduction <maximumf>, %28, %cst_14 [1] : vector<64x16xf32> to vector<64xf32>
    %30 = vector.shape_cast %29 : vector<64xf32> to vector<64x1xf32>
    %31 = vector.broadcast %30 : vector<64x1xf32> to vector<64x16xf32>
    %32 = arith.subf %28, %31 : vector<64x16xf32>
    %33 = math.exp %32 : vector<64x16xf32>
    %cst_15 = arith.constant dense<0.000000e+00> : vector<64xf32>
    %34 = vector.multi_reduction <add>, %33, %cst_15 [1] : vector<64x16xf32> to vector<64xf32>
    %35 = vector.shape_cast %34 : vector<64xf32> to vector<64x1xf32>
    %36 = tpu.reciprocal %35 {approx = true} : vector<64x1xf32> -> vector<64x1xf32>
    %37 = vector.broadcast %36 : vector<64x1xf32> to vector<64x16xf32>
    %38 = arith.mulf %33, %37 : vector<64x16xf32>
    %39 = vector.extract_strided_slice %38 {offsets = [0, 0], sizes = [16, 16], strides = [1, 1]} : vector<64x16xf32> to vector<16x16xf32>
    %40 = vector.extract_strided_slice %13 {offsets = [0, 0], sizes = [16, 32], strides = [1, 1]} : vector<16x128xf32> to vector<16x32xf32>
    %cst_16 = arith.constant dense<0.000000e+00> : vector<16x32xf32>
    %41 = tpu.matmul %39, %40, %cst_16 {dimension_numbers = #tpu.dot_dimension_numbers<[1], [0], [0], [1], [0, 0, 1, 1], [], []>} : vector<16x16xf32>, vector<16x32xf32>, vector<16x32xf32> -> vector<16x32xf32>
    %42 = vector.extract_strided_slice %38 {offsets = [16, 0], sizes = [16, 16], strides = [1, 1]} : vector<64x16xf32> to vector<16x16xf32>
    %43 = vector.extract_strided_slice %13 {offsets = [0, 32], sizes = [16, 32], strides = [1, 1]} : vector<16x128xf32> to vector<16x32xf32>
    %cst_17 = arith.constant dense<0.000000e+00> : vector<16x32xf32>
    %44 = tpu.matmul %42, %43, %cst_17 {dimension_numbers = #tpu.dot_dimension_numbers<[1], [0], [0], [1], [0, 0, 1, 1], [], []>} : vector<16x16xf32>, vector<16x32xf32>, vector<16x32xf32> -> vector<16x32xf32>
    %45 = vector.extract_strided_slice %38 {offsets = [32, 0], sizes = [16, 16], strides = [1, 1]} : vector<64x16xf32> to vector<16x16xf32>
    %46 = vector.extract_strided_slice %13 {offsets = [0, 64], sizes = [16, 32], strides = [1, 1]} : vector<16x128xf32> to vector<16x32xf32>
    %cst_18 = arith.constant dense<0.000000e+00> : vector<16x32xf32>
    %47 = tpu.matmul %45, %46, %cst_18 {dimension_numbers = #tpu.dot_dimension_numbers<[1], [0], [0], [1], [0, 0, 1, 1], [], []>} : vector<16x16xf32>, vector<16x32xf32>, vector<16x32xf32> -> vector<16x32xf32>
    %48 = vector.extract_strided_slice %38 {offsets = [48, 0], sizes = [16, 16], strides = [1, 1]} : vector<64x16xf32> to vector<16x16xf32>
    %49 = vector.extract_strided_slice %13 {offsets = [0, 96], sizes = [16, 32], strides = [1, 1]} : vector<16x128xf32> to vector<16x32xf32>
    %cst_19 = arith.constant dense<0.000000e+00> : vector<16x32xf32>
    %50 = tpu.matmul %48, %49, %cst_19 {dimension_numbers = #tpu.dot_dimension_numbers<[1], [0], [0], [1], [0, 0, 1, 1], [], []>} : vector<16x16xf32>, vector<16x32xf32>, vector<16x32xf32> -> vector<16x32xf32>
    %51 = arith.addf %41, %44 : vector<16x32xf32>
    %52 = arith.addf %47, %50 : vector<16x32xf32>
    %53 = arith.addf %51, %52 : vector<16x32xf32>
    %54 = vector.broadcast %3 : vector<1x32xf32> to vector<16x32xf32>
    %55 = arith.addf %53, %54 : vector<16x32xf32>
    %cst_20 = arith.constant dense<0.000000e+00> : vector<16xf32>
    %56 = vector.multi_reduction <add>, %55, %cst_20 [1] : vector<16x32xf32> to vector<16xf32>
    %57 = vector.shape_cast %56 : vector<16xf32> to vector<16x1xf32>
    %cst_21 = arith.constant 3.200000e+01 : f32
    %58 = vector.broadcast %cst_21 : f32 to vector<16x1xf32>
    %59 = arith.divf %57, %58 : vector<16x1xf32>
    %60 = vector.broadcast %59 : vector<16x1xf32> to vector<16x32xf32>
    %61 = arith.subf %55, %60 : vector<16x32xf32>
    %62 = arith.mulf %61, %61 : vector<16x32xf32>
    %cst_22 = arith.constant dense<0.000000e+00> : vector<16xf32>
    %63 = vector.multi_reduction <add>, %62, %cst_22 [1] : vector<16x32xf32> to vector<16xf32>
    %64 = vector.shape_cast %63 : vector<16xf32> to vector<16x1xf32>
    %cst_23 = arith.constant 3.200000e+01 : f32
    %65 = vector.broadcast %cst_23 : f32 to vector<16x1xf32>
    %66 = arith.divf %64, %65 : vector<16x1xf32>
    %67 = vector.broadcast %59 : vector<16x1xf32> to vector<16x32xf32>
    %68 = arith.subf %55, %67 : vector<16x32xf32>
    %cst_24 = arith.constant 9.99999974E-6 : f32
    %69 = vector.broadcast %cst_24 : f32 to vector<16x1xf32>
    %70 = arith.addf %66, %69 : vector<16x1xf32>
    %71 = math.rsqrt %70 : vector<16x1xf32>
    %72 = vector.broadcast %71 : vector<16x1xf32> to vector<16x32xf32>
    %73 = arith.mulf %68, %72 : vector<16x32xf32>
    %74 = vector.broadcast %4 : vector<1x32xf32> to vector<16x32xf32>
    %75 = arith.mulf %73, %74 : vector<16x32xf32>
    %76 = vector.broadcast %5 : vector<1x32xf32> to vector<16x32xf32>
    %77 = arith.addf %75, %76 : vector<16x32xf32>
    %78 = arith.addf %0, %77 : vector<16x32xf32>
    %79 = arith.truncf %78 : vector<16x32xf32> to vector<16x32xbf16>
    %c0_25 = arith.constant 0 : index
    %c0_26 = arith.constant 0 : index
    %80 = vector.load %arg4[%c0_25, %c0_26] : memref<32x128xbf16, #tpu.memory_space<vmem>>, vector<32x128xbf16>
    %cst_27 = arith.constant dense<0.000000e+00> : vector<16x128xf32>
    %81 = tpu.matmul %79, %80, %cst_27 {dimension_numbers = #tpu.dot_dimension_numbers<[1], [0], [0], [1], [0, 0, 1, 1], [], []>} : vector<16x32xbf16>, vector<32x128xbf16>, vector<16x128xf32> -> vector<16x128xf32>
    %82 = vector.broadcast %2 : vector<1x128xf32> to vector<16x128xf32>
    %83 = arith.addf %81, %82 : vector<16x128xf32>
    %84 = arith.mulf %83, %83 : vector<16x128xf32>
    %85 = arith.mulf %83, %84 : vector<16x128xf32>
    %cst_28 = arith.constant 4.471500e-02 : f32
    %86 = vector.broadcast %cst_28 : f32 to vector<16x128xf32>
    %87 = arith.mulf %86, %85 : vector<16x128xf32>
    %88 = arith.addf %83, %87 : vector<16x128xf32>
    %cst_29 = arith.constant 0.797884583 : f32
    %89 = vector.broadcast %cst_29 : f32 to vector<16x128xf32>
    %90 = arith.mulf %89, %88 : vector<16x128xf32>
    %91 = math.tanh %90 : vector<16x128xf32>
    %cst_30 = arith.constant 1.000000e+00 : f32
    %92 = vector.broadcast %cst_30 : f32 to vector<16x128xf32>
    %93 = arith.addf %92, %91 : vector<16x128xf32>
    %cst_31 = arith.constant 5.000000e-01 : f32
    %94 = vector.broadcast %cst_31 : f32 to vector<16x128xf32>
    %95 = arith.mulf %94, %93 : vector<16x128xf32>
    %96 = arith.mulf %83, %95 : vector<16x128xf32>
    %97 = arith.truncf %96 : vector<16x128xf32> to vector<16x128xbf16>
    %c0_32 = arith.constant 0 : index
    %c0_33 = arith.constant 0 : index
    %98 = vector.load %arg5[%c0_32, %c0_33] : memref<128x32xbf16, #tpu.memory_space<vmem>>, vector<128x32xbf16>
    %cst_34 = arith.constant dense<0.000000e+00> : vector<16x32xf32>
    %99 = tpu.matmul %97, %98, %cst_34 {dimension_numbers = #tpu.dot_dimension_numbers<[1], [0], [0], [1], [0, 0, 1, 1], [], []>} : vector<16x128xbf16>, vector<128x32xbf16>, vector<16x32xf32> -> vector<16x32xf32>
    %100 = vector.broadcast %6 : vector<1x32xf32> to vector<16x32xf32>
    %101 = arith.addf %99, %100 : vector<16x32xf32>
    %cst_35 = arith.constant dense<0.000000e+00> : vector<16xf32>
    %102 = vector.multi_reduction <add>, %101, %cst_35 [1] : vector<16x32xf32> to vector<16xf32>
    %103 = vector.shape_cast %102 : vector<16xf32> to vector<16x1xf32>
    %cst_36 = arith.constant 3.200000e+01 : f32
    %104 = vector.broadcast %cst_36 : f32 to vector<16x1xf32>
    %105 = arith.divf %103, %104 : vector<16x1xf32>
    %106 = vector.broadcast %105 : vector<16x1xf32> to vector<16x32xf32>
    %107 = arith.subf %101, %106 : vector<16x32xf32>
    %108 = arith.mulf %107, %107 : vector<16x32xf32>
    %cst_37 = arith.constant dense<0.000000e+00> : vector<16xf32>
    %109 = vector.multi_reduction <add>, %108, %cst_37 [1] : vector<16x32xf32> to vector<16xf32>
    %110 = vector.shape_cast %109 : vector<16xf32> to vector<16x1xf32>
    %cst_38 = arith.constant 3.200000e+01 : f32
    %111 = vector.broadcast %cst_38 : f32 to vector<16x1xf32>
    %112 = arith.divf %110, %111 : vector<16x1xf32>
    %113 = vector.broadcast %105 : vector<16x1xf32> to vector<16x32xf32>
    %114 = arith.subf %101, %113 : vector<16x32xf32>
    %cst_39 = arith.constant 9.99999974E-6 : f32
    %115 = vector.broadcast %cst_39 : f32 to vector<16x1xf32>
    %116 = arith.addf %112, %115 : vector<16x1xf32>
    %117 = math.rsqrt %116 : vector<16x1xf32>
    %118 = vector.broadcast %117 : vector<16x1xf32> to vector<16x32xf32>
    %119 = arith.mulf %114, %118 : vector<16x32xf32>
    %120 = vector.broadcast %7 : vector<1x32xf32> to vector<16x32xf32>
    %121 = arith.mulf %119, %120 : vector<16x32xf32>
    %122 = vector.broadcast %8 : vector<1x32xf32> to vector<16x32xf32>
    %123 = arith.addf %121, %122 : vector<16x32xf32>
    %124 = arith.addf %78, %123 : vector<16x32xf32>
    %c0_40 = arith.constant 0 : index
    %c0_41 = arith.constant 0 : index
    %125 = vector.load %arg7[%c0_40, %c0_41] : memref<16x32xf32, #tpu.memory_space<vmem>>, vector<16x32xf32>
    tpu.vector_store %arg7[%c0_40, %c0_41], %124 {strides = array<i32>} : memref<16x32xf32, #tpu.memory_space<vmem>>, vector<16x32xf32>,
    return
  }
}

</mosaic_0001>

<bundles_post_ra>
// kernel: tpu_custom_call.1
= control target key start
LH: loop header
LB: loop body
LE: loop exit
PB: predicated region body
PF: predicated region fallthrough
CT: control target
= control target key end

     0   :  { %v1630_v1 = vmov 0.0   ;;  %vm1631_vm0 = vmmov 0   ;;  %vm48_vm1 = vcmask 261120   ;;  %s1925_s0 = inlined_call_operand.vmem [shape: f32[16,32], index: 0, kind: input, shape index: {}]   ;;  %s1926_s1 = inlined_call_operand.vmem [shape: f32[64,16], index: 1, kind: input, shape index: {}]   ;;  %s1927_s2 = inlined_call_operand.vmem [shape: bf16[32,64], index: 2, kind: input, shape index: {}]   ;;  %s1928_s3 = inlined_call_operand.vmem [shape: bf16[32,128], index: 3, kind: input, shape index: {}]   ;;  %s1929_s4 = inlined_call_operand.vmem [shape: bf16[32,128], index: 4, kind: input, shape index: {}]   ;;  %s1930_s5 = inlined_call_operand.vmem [shape: bf16[128,32], index: 5, kind: input, shape index: {}]   ;;  %s1931_s6 = inlined_call_operand.vmem [shape: f32[8,128], index: 6, kind: input, shape index: {}]   ;;  %s1932_s7 = inlined_call_operand.hbm [shape: f32[16,32], index: 7, kind: output, shape index: {}]  }
   0x1   :  { %v1548_v0 = vld [vmem:[%s1927_s2] sm:$0xff]   ;;  %1353 = vmatprep.subr.bf16.mxu0 %v1630_v1  ;;  %v1549_v2 = vld [vmem:[%s1927_s2 + $0x8] sm:$0xff]   ;;  %1357 = vmatprep.mubr.msk.bf16.mxu0 %vm1631_vm0, %v1630_v1 }
   0x2   :  { %1354 = vmatpush3.bf16.msra.mxu0 %v1548_v0  ;;  %v1696_v3 = vld [vmem:[%s1925_s0] sm:$0xff]  ;;  %v1701_v4 = vld [vmem:[%s1925_s0 + $0x8] sm:$0xff] }
   0x3   :  { %1355 = vmatprep.subr.bf16.mxu0 %v1630_v1  ;;  %v1550_v5 = vld [vmem:[%s1928_s3] sm:$0xff]   ;;  %v31_v6 = vpack.c.bf16 %v1701_v4, %v1696_v3  ;;  %v1551_v7 = vld [vmem:[%s1928_s3 + $0x8] sm:$0xff]  }
   0x6   :  { %1356 = vmatpush3.bf16.msra.mxu0 %v1549_v2 }
   0x7   :  { %1361 = vmatprep.subr.bf16.mxu0 %v1630_v1 }
   0x9   :  { %1358 = vmatmul.mubr.msk.bf16.vlgmr.msra.gmra.mrb[0].mxu0 %vm48_vm1, %v31_v6 }
   0xa   :  { %1362 = vmatpush3.bf16.msra.mxu0 %v1550_v5  ;;  %1365 = vmatprep.mubr.msk.bf16.mxu0 %vm1631_vm0, %v1630_v1 }
   0xb   :  { %1363 = vmatprep.subr.bf16.mxu0 %v1630_v1 }
   0xc   :  { %12 = vsyncpa [#allocation3], 0  ;;  %vm156_vm2 = vcmask 64512   ;;  %s1632_s0 = smov 72   ;;  %s1633_s3 = smov 96   ;;  %v516_v46 = vld [vmem:[%s1926_s1 + $0x18] sm:$0xff] }
   0xd   :  { %s1634_s12 = smov 120   ;;  %s1635_s13 = smov 88   ;;  %vm1722_vm3 = vmpackc.low %vm156_vm2, %vm156_vm2  ;;  %v515_v47 = vld [vmem:[%s1926_s1 + $0x10] sm:$0xff]  ;;  %v513_v48 = vld [vmem:[%s1926_s1] sm:$0xff]  ;;  %vm529_vm4 = vcmask 130048  }
   0xe   :  { %1364 = vmatpush3.bf16.msra.mxu0 %v1551_v7  ;;  %s1636_s14 = smov 104   ;;  %s1637_s15 = smov 80   ;;  %v519_v50 = vld [vmem:[%s1926_s1 + $0x30] sm:$0xff]  ;;  %v520_v58 = vld [vmem:[%s1926_s1 + $0x38] sm:$0xff]  ;;  %v517_v60 = vld [vmem:[%s1926_s1 + $0x20] sm:$0xff] }
   0xf   :  { %s1638_s16 = smov 112   ;;  %v514_v0 = vld [vmem:[%s1926_s1 + $0x8] sm:$0xff]  ;;  %s1640_s2 = smov 32  }
  0x11   :  { %1366 = vmatmul.mubr.msk.bf16.vlgmr.msra.gmra.mrb[4].mxu0 %vm48_vm1, %v31_v6 }
  0xdc   :  { %v86_v8 = vpop.f32.mrb[0].mxu0 }
  0xdd   :  { %v1359_v9 = vpop.f32.mrb[1].mxu0  ;;  %1373 = vmatprep.mubr.msk.f32.mxu0 %vm156_vm2, %v86_v8 }
  0xde   :  { %v89_v10 = vpop.f32.mrb[2].mxu0  ;;  %v518_v9 = vld [vmem:[%s1926_s1 + $0x28] sm:$0xff]  ;;  %s1639_s1 = smov 64  }
  0xdf   :  { %v1360_v11 = vpop.f32.mrb[3].mxu0  ;;  %v1523_v12 = vpack.i.bf16 %v89_v10, %v86_v8 }
  0xe1   :  { %1524 = vrot.lane.b32.xlu1 %v1523_v12, %s1632_s0  ;;  %1514 = vrot.lane.b32.xlu0 %v1523_v12, %s1633_s3 }
  0xe4   :  { %v143_v13 = vpop.f32.mrb[4].mxu0 }
  0xe5   :  { %240 = vrot.lane.b32.xlu1 %v86_v8, %s1634_s12  ;;  %1519 = vrot.lane.b32.xlu0 %v1523_v12, %s1635_s13  ;;  %v1367_v14 = vpop.f32.mrb[5].mxu0 }
  0xe6   :  { %v146_v15 = vpop.f32.mrb[6].mxu0 }
  0xe7   :  { %v1368_v16 = vpop.f32.mrb[7].mxu0  ;;  %v1752_v40 = vpack.i.bf16 %v146_v15, %v143_v13  ;;  %v1754_v41 = vpack.c.bf16 %v146_v15, %v143_v13 }
  0xe9   :  { %422 = vrot.lane.b32.xlu1 %v86_v8, %s1636_s14  ;;  %242 = vrot.lane.b32.xlu0 %v89_v10, %s1634_s12 }
  0xed   :  { %1529 = vrot.lane.b32.xlu1 %v1523_v12, %s1637_s15  ;;  %424 = vrot.lane.b32.xlu0 %v89_v10, %s1636_s14 }
  0xf1   :  { %333 = vrot.lane.b32.xlu1 %v89_v10, %s1638_s16  ;;  %331 = vrot.lane.b32.xlu0 %v86_v8, %s1638_s16 }
 0x153   :  { %v1525_v17 = vpop.permute.xlu1 %1524  ;;  %v1515_v18 = vpop.permute.xlu0 %1514 }
 0x154   :  { %v1527_v19 = vunpack.i.h.bf16 %v1525_v17  ;;  %v1526_v20 = vunpack.i.l.bf16 %v1525_v17  ;;  %v1517_v21 = vunpack.i.h.bf16 %v1515_v18  ;;  %v1516_v22 = vunpack.i.l.bf16 %v1515_v18 }
 0x156   :  { %v1453_v24 = vpack.c.bf16 %v1517_v21, %v1516_v22  ;;  %v1471_v25 = vpack.c.bf16 %v1527_v19, %v1526_v20 }
 0x157   :  { %v241_v26 = vpop.permute.xlu1 %240  ;;  %v1520_v27 = vpop.permute.xlu0 %1519 }
 0x158   :  { %v1522_v28 = vunpack.i.h.bf16 %v1520_v27  ;;  %v1521_v29 = vunpack.i.l.bf16 %v1520_v27  ;;  %1455 = vmatprep.subr.msk.bf16.mxu0 %vm1722_vm3, %v1453_v24  ;;  %1473 = vmatprep.subr.msk.bf16.mxu1 %vm1722_vm3, %v1471_v25 }
 0x159   :  { %1458 = vmatpush3.bf16.xpose.msk.msra.mxu0 %vm1722_vm3, %v1453_v24  ;;  %1476 = vmatpush3.bf16.xpose.msk.msra.mxu1 %vm1722_vm3, %v1471_v25 }
 0x15a   :  { %v1459_v30 = vpack.c.bf16 %v1522_v28, %v1521_v29  ;;  %1425 = vmatprep.subr.bf16.mxu1 %v1630_v1 }
 0x15b   :  { %v423_v31 = vpop.permute.xlu1 %422  ;;  %v243_v32 = vpop.permute.xlu0 %242 }
 0x15c   :  { %1461 = vmatprep.subr.msk.bf16.mxu0 %vm1722_vm3, %v1459_v30  ;;  %1394 = vmatprep.mubr.msk.f32.mxu1 %vm156_vm2, %v423_v31 }
 0x15f   :  { %v1530_v33 = vpop.permute.xlu1 %1529  ;;  %v425_v34 = vpop.permute.xlu0 %424 }
 0x160   :  { %v1532_v35 = vunpack.i.h.bf16 %v1530_v33  ;;  %v1531_v36 = vunpack.i.l.bf16 %v1530_v33  ;;  %1374 = vmatmul.mubr.msk.f32.vlgmr.msra.gmra.mrb[8].mxu0 %vm156_vm2, %v89_v10  ;;  %1395 = vmatmul.mubr.msk.f32.vlgmr.msra.gmra.mrb[0].mxu1 %vm156_vm2, %v425_v34 }
 0x161   :  { %1464 = vmatpush3.bf16.xpose.msk.msra.mxu0 %vm1722_vm3, %v1459_v30  ;;  %1380 = vmatprep.mubr.msk.f32.mxu0 %vm156_vm2, %v241_v26 }
 0x162   :  { %v1465_v37 = vpack.c.bf16 %v1532_v35, %v1531_v36  ;;  %1429 = vmatprep.mubr.msk.bf16.mxu1 %vm1631_vm0, %v1630_v1 }
 0x163   :  { %v332_v38 = vpop.permute.xlu0 %331  ;;  %v334_v39 = vpop.permute.xlu1 %333 }
 0x164   :  { %1467 = vmatprep.subr.msk.bf16.mxu0 %vm1722_vm3, %v1465_v37 }
 0x168   :  { %1381 = vmatmul.mubr.msk.f32.vlgmr.msra.gmra.mrb[10].mxu0 %vm156_vm2, %v243_v32 }
 0x169   :  { %1470 = vmatpush3.bf16.xpose.msk.msra.mxu0 %vm1722_vm3, %v1465_v37  ;;  %1387 = vmatprep.mubr.msk.f32.mxu0 %vm156_vm2, %v332_v38 }
 0x170   :  { %1388 = vmatmul.mubr.msk.f32.vlgmr.msra.gmra.mrb[12].mxu0 %vm156_vm2, %v334_v39 }
 0x233   :  { %v1375_v42 = vpop.f32.mrb[8].mxu0  ;;  %v1396_v43 = vpop.f32.mrb[0].mxu1 }
 0x234   :  { %v231_v44 = vpop.f32.mrb[9].mxu0  ;;  %v504_v45 = vpop.f32.mrb[1].mxu1  ;;  %v528_v61 = vadd.f32 %v1396_v43, %v520_v58  ;;  %v522_v6 = vadd.f32 %v1375_v42, %v514_v0 }
 0x235   :  { %v521_v54 = vadd.f32 %v513_v48, %v231_v44  ;;  %v527_v56 = vadd.f32 %v519_v50, %v504_v45 }
 0x236   :  { %v551_v7 = vsel %vm529_vm4, %v528_v61, -inf  ;;  %v533_v11 = vsel %vm529_vm4, %v522_v6, -inf }
 0x237   :  { %v530_v59 = vsel %vm529_vm4, %v521_v54, -inf  ;;  %v548_v63 = vsel %vm529_vm4, %v527_v56, -inf }
 0x23b   :  { %v1382_v49 = vpop.f32.mrb[10].mxu0 }
 0x23c   :  { %v524_v51 = vadd.f32 %v1382_v49, %v516_v46  ;;  %v322_v52 = vpop.f32.mrb[11].mxu0 }
 0x23d   :  { %v523_v53 = vadd.f32 %v515_v47, %v322_v52 }
 0x23e   :  { %v539_v55 = vsel %vm529_vm4, %v524_v51, -inf }
 0x23f   :  { %540 = vmax.xlane.f32.xlu1 %v539_v55  ;;  %v536_v57 = vsel %vm529_vm4, %v523_v53, -inf }
 0x240   :  { %537 = vmax.xlane.f32.xlu0 %v536_v57 }
 0x243   :  { %531 = vmax.xlane.f32.xlu1 %v530_v59  ;;  %v1389_v62 = vpop.f32.mrb[12].mxu0 }
 0x244   :  { %549 = vmax.xlane.f32.xlu0 %v548_v63  ;;  %v413_v2 = vpop.f32.mrb[13].mxu0  ;;  %v526_v10 = vadd.f32 %v1389_v62, %v518_v9 }
 0x245   :  { %v525_v5 = vadd.f32 %v517_v60, %v413_v2 }
 0x246   :  { %v545_v12 = vsel %vm529_vm4, %v526_v10, -inf }
 0x247   :  { %v542_v8 = vsel %vm529_vm4, %v525_v5, -inf }
 0x248   :  { %552 = vmax.xlane.f32.xlu0 %v551_v7  ;;  %543 = vmax.xlane.f32.xlu1 %v542_v8 }
 0x24c   :  { %534 = vmax.xlane.f32.xlu0 %v533_v11 }
 0x250   :  { %546 = vmax.xlane.f32.xlu0 %v545_v12 }
 0x2cc   :  { %v541_v13 = vpop.xlane.xlu1 %540 }
 0x2cd   :  { %v538_v14 = vpop.xlane.xlu0 %537  ;;  %v557_v24 = vsub.f32 %v524_v51, %v541_v13 }
 0x2ce   :  { %v556_v19 = vsub.f32 %v523_v53, %v538_v14 }
 0x2cf   :  { %v568_v29 = vmul.f32 1.442695, %v557_v24 }
 0x2d0   :  { %v532_v15 = vpop.xlane.xlu1 %531  ;;  %v566_v25 = vmul.f32 1.442695, %v556_v19 }
 0x2d1   :  { %v554_v16 = vsub.f32 %v521_v54, %v532_v15  ;;  %v550_v17 = vpop.xlane.xlu0 %549 }
 0x2d2   :  { %v560_v18 = vsub.f32 %v527_v56, %v550_v17 }
 0x2d3   :  { %v562_v20 = vmul.f32 1.442695, %v554_v16 }
 0x2d4   :  { %v574_v21 = vmul.f32 1.442695, %v560_v18 }
 0x2d5   :  { %v553_v22 = vpop.xlane.xlu0 %552  ;;  %v544_v31 = vpop.xlane.xlu1 %543 }
 0x2d6   :  { %1562 = vpow2.f32 %v574_v21  ;;  %v561_v23 = vsub.f32 %v528_v61, %v553_v22  ;;  %v558_v35 = vsub.f32 %v525_v5, %v544_v31  ;;  %v1836_v31 = vld [vmem:[%s1931_s6] sm:$0xff] }
 0x2d7   :  { %1564 = vpow2.f32 %v562_v20 }
 0x2d8   :  { %v576_v26 = vmul.f32 1.442695, %v561_v23  ;;  %v570_v42 = vmul.f32 1.442695, %v558_v35 }
 0x2d9   :  { %v535_v27 = vpop.xlane.xlu0 %534 }
 0x2da   :  { %1566 = vpow2.f32 %v576_v26  ;;  %v555_v28 = vsub.f32 %v522_v6, %v535_v27 }
 0x2db   :  { %1568 = vpow2.f32 %v566_v25 }
 0x2dc   :  { %v564_v30 = vmul.f32 1.442695, %v555_v28 }
 0x2dd   :  { %v547_v32 = vpop.xlane.xlu0 %546 }
 0x2de   :  { %1570 = vpow2.f32 %v564_v30  ;;  %v559_v33 = vsub.f32 %v526_v10, %v547_v32 }
 0x2df   :  { %1572 = vpow2.f32 %v568_v29  ;;  %v964_v29 = vlaneseq }
 0x2e0   :  { %v1788_v34 = vpop.eup %1562  ;;  %v572_v36 = vmul.f32 1.442695, %v559_v33 }
 0x2e1   :  { %v596_v37 = vsel %vm529_vm4, %v1788_v34, 0.0  ;;  %v1792_v38 = vpop.eup %1564 }
 0x2e2   :  { %597 = vadd.xlane.f32.xlu1 %v596_v37  ;;  %1574 = vpow2.f32 %v572_v36  ;;  %v578_v44 = vsel %vm529_vm4, %v1792_v38, 0.0 }
 0x2e3   :  { %1576 = vpow2.f32 %v570_v42 }
 0x2e4   :  { %v1794_v39 = vpop.eup %1566 }
 0x2e5   :  { %v599_v43 = vsel %vm529_vm4, %v1794_v39, 0.0  ;;  %v1569_v45 = vpop.eup %1568 }
 0x2e6   :  { %600 = vadd.xlane.f32.xlu0 %v599_v43  ;;  %579 = vadd.xlane.f32.xlu1 %v578_v44  ;;  %v584_v48 = vsel %vm529_vm4, %v1569_v45, 0.0 }
 0x2e8   :  { %v1800_v46 = vpop.eup %1570 }
 0x2e9   :  { %v581_v47 = vsel %vm529_vm4, %v1800_v46, 0.0  ;;  %v1573_v49 = vpop.eup %1572 }
 0x2ea   :  { %582 = vadd.xlane.f32.xlu0 %v581_v47  ;;  %585 = vadd.xlane.f32.xlu1 %v584_v48  ;;  %v587_v50 = vsel %vm529_vm4, %v1573_v49, 0.0 }
 0x2ec   :  { %v1806_v51 = vpop.eup %1574 }
 0x2ed   :  { %v593_v52 = vsel %vm529_vm4, %v1806_v51, 0.0  ;;  %v1577_v53 = vpop.eup %1576 }
 0x2ee   :  { %588 = vadd.xlane.f32.xlu0 %v587_v50  ;;  %v590_v54 = vsel %vm529_vm4, %v1577_v53, 0.0 }
 0x2f2   :  { %594 = vadd.xlane.f32.xlu0 %v593_v52  ;;  %v1553_v52 = vld [vmem:[%s1929_s4 + $0x8] sm:$0xff]  }
 0x2f6   :  { %591 = vadd.xlane.f32.xlu0 %v590_v54 }
 0x2fb   :  { %1534 = vrot.lane.b32.xlu1 %v1752_v40, %s1633_s3 }
 0x2ff   :  { %1544 = vrot.lane.b32.xlu1 %v1752_v40, %s1639_s1 }
 0x30c   :  { %1539 = vrot.lane.b32.xlu0 %v1752_v40, %s1640_s2 }
 0x36f   :  { %v598_v55 = vpop.xlane.xlu1 %597 }
 0x373   :  { %v601_v56 = vpop.xlane.xlu0 %600  ;;  %v580_v57 = vpop.xlane.xlu1 %579 }
 0x377   :  { %v583_v58 = vpop.xlane.xlu0 %582  ;;  %v586_v59 = vpop.xlane.xlu1 %585 }
 0x378   :  { %1578 = vrcp.f32 %v586_v59 }
 0x379   :  { %1580 = vrcp.f32 %v598_v55 }
 0x37b   :  { %v589_v60 = vpop.xlane.xlu0 %588  ;;  %v1535_v61 = vpop.permute.xlu1 %1534 }
 0x37c   :  { %1582 = vrcp.f32 %v589_v60  ;;  %v1537_v62 = vunpack.i.h.bf16 %v1535_v61  ;;  %v1536_v63 = vunpack.i.l.bf16 %v1535_v61 }
 0x37d   :  { %1584 = vrcp.f32 %v601_v56 }
 0x37e   :  { %v1477_v0 = vpack.c.bf16 %v1537_v62, %v1536_v63  ;;  %1586 = vrcp.f32 %v580_v57 }
 0x37f   :  { %v595_v2 = vpop.xlane.xlu0 %594  ;;  %1588 = vrcp.f32 %v583_v58  ;;  %v1545_v14 = vpop.permute.xlu1 %1544 }
 0x380   :  { %1478 = vmatprep.subr.bf16.mxu0 %v1477_v0  ;;  %v1547_v18 = vunpack.i.h.bf16 %v1545_v14  ;;  %v1546_v19 = vunpack.i.l.bf16 %v1545_v14  ;;  %v1558_v14 = vld [vmem:[%s1930_s5 + $0x20] sm:$0xff]  }
 0x381   :  { %1480 = vmatpush3.bf16.msra.mxu0 %v1477_v0 }
 0x382   :  { %v1579_v5 = vpop.eup %1578  ;;  %v1489_v22 = vpack.c.bf16 %v1547_v18, %v1546_v19 }
 0x383   :  { %v592_v40 = vpop.xlane.xlu0 %591  ;;  %v612_v6 = vmul.f32 %v1579_v5, %v1569_v45  ;;  %v1581_v7 = vpop.eup %1580 }
 0x384   :  { %v616_v13 = vmul.f32 %v1581_v7, %v1788_v34  ;;  %1590 = vrcp.f32 %v592_v40 }
 0x385   :  { %1401 = vmatprep.mubr.msk.f32.mxu0 %vm529_vm4, %v612_v6  ;;  %1592 = vrcp.f32 %v595_v2 }
 0x386   :  { %v1583_v8 = vpop.eup %1582 }
 0x387   :  { %v613_v9 = vmul.f32 %v1583_v8, %v1573_v49  ;;  %v1540_v10 = vpop.permute.xlu0 %1539  ;;  %v1585_v16 = vpop.eup %1584 }
 0x388   :  { %v1542_v11 = vunpack.i.h.bf16 %v1540_v10  ;;  %v1541_v12 = vunpack.i.l.bf16 %v1540_v10  ;;  %v1587_v17 = vpop.eup %1586  ;;  %v617_v20 = vmul.f32 %v1585_v16, %v1794_v39  ;;  %v1560_v16 = vld [vmem:[%s1930_s5 + $0x30] sm:$0xff]  }
 0x389   :  { %1402 = vmatmul.mubr.msk.f32.vlgmr.msra.gmra.mrb[14].mxu0 %vm529_vm4, %v613_v9  ;;  %v610_v21 = vmul.f32 %v1587_v17, %v1792_v38  ;;  %v1589_v23 = vpop.eup %1588  ;;  %v1561_v17 = vld [vmem:[%s1930_s5 + $0x38] sm:$0xff]  }
 0x38a   :  { %v1481_v15 = vpack.c.bf16 %v1542_v11, %v1541_v12  ;;  %1408 = vmatprep.mubr.msk.f32.mxu0 %vm529_vm4, %v616_v13  ;;  %v611_v25 = vmul.f32 %v1589_v23, %v1800_v46  ;;  %v1554_v12 = vld [vmem:[%s1930_s5] sm:$0xff]   ;;  %v1557_v13 = vld [vmem:[%s1930_s5 + $0x18] sm:$0xff]  }
 0x38c   :  { %1482 = vmatprep.subr.bf16.mxu0 %v1481_v15 }
 0x38d   :  { %1484 = vmatpush3.bf16.msra.mxu0 %v1481_v15  ;;  %v1559_v15 = vld [vmem:[%s1930_s5 + $0x28] sm:$0xff]  }
 0x38e   :  { %1486 = vmatprep.subr.bf16.mxu0 %v1754_v41  ;;  %v1591_v24 = vpop.eup %1590 }
 0x38f   :  { %v614_v26 = vmul.f32 %v1591_v24, %v1577_v53  ;;  %v1593_v27 = vpop.eup %1592 }
 0x390   :  { %v615_v28 = vmul.f32 %v1593_v27, %v1806_v51  ;;  %v1552_v51 = vld [vmem:[%s1929_s4] sm:$0xff]  }
 0x391   :  { %1409 = vmatmul.mubr.msk.f32.vlgmr.msra.gmra.mrb[14].mxu0 %vm529_vm4, %v617_v20  ;;  %1426 = vmatpush3.bf16.msra.mxu1 %v1552_v51 }
 0x392   :  { %1488 = vmatpush3.bf16.msra.mxu0 %v1754_v41  ;;  %1415 = vmatprep.mubr.msk.f32.mxu0 %vm529_vm4, %v610_v21  ;;  %v1830_v41 = vshrl.u32 %v964_v29, 7 }
 0x393   :  { %1490 = vmatprep.subr.bf16.mxu0 %v1489_v22  ;;  %1427 = vmatprep.subr.bf16.mxu1 %v1630_v1 }
 0x394   :  { %v966_v30 = vsub.s32 1, %v1830_v41  ;;  %v999_v59 = vsub.s32 2, %v1830_v41  ;;  %v1005_v61 = vsub.s32 3, %v1830_v41  ;;  %v1018_v18 = vsub.s32 0, %v1830_v41 }
 0x395   :  { %1428 = vmatpush3.bf16.msra.mxu1 %v1553_v52 }
 0x396   :  { %v967_v32 = vrot.slane %v1836_v31, %v966_v30  ;;  %1433 = vmatprep.subr.bf16.mxu1 %v1630_v1  ;;  %v1000_v60 = vrot.slane %v1836_v31, %v999_v59  ;;  %v1006_v2 = vrot.slane %v1836_v31, %v1005_v61  ;;  %v1019_v19 = vrot.slane %v1836_v31, %v1018_v18 }
 0x399   :  { %1416 = vmatmul.mubr.msk.f32.vlgmr.msra.gmra.mrb[14].mxu0 %vm529_vm4, %v611_v25 }
 0x39a   :  { %1492 = vmatpush3.bf16.msra.mxu0 %v1489_v22  ;;  %1422 = vmatprep.mubr.msk.f32.mxu0 %vm529_vm4, %v614_v26 }
 0x3a1   :  { %1423 = vmatmul.mubr.msk.f32.vlgmr.msra.gmra.mrb[14].mxu0 %vm529_vm4, %v615_v28 }
 0x474   :  { %v1424_v33 = vpop.f32.mrb[14].mxu0 }
 0x475   :  { %v969_v34 = vadd.f32 %v1424_v33, %v967_v32  ;;  %v953_v35 = vpop.f32.mrb[15].mxu0 }
 0x476   :  { %v968_v36 = vadd.f32 %v967_v32, %v953_v35 }
 0x477   :  { %v973_v37 = vsel %vm48_vm1, %v969_v34, 0.0 }
 0x478   :  { %974 = vadd.xlane.f32.xlu0 %v973_v37  ;;  %v970_v38 = vsel %vm48_vm1, %v968_v36, 0.0 }
 0x479   :  { %971 = vadd.xlane.f32.xlu1 %v970_v38 }
 0x505   :  { %v975_v39 = vpop.xlane.xlu0 %974 }
 0x506   :  { %v978_v42 = vmul.f32 0.03125, %v975_v39  ;;  %v972_v43 = vpop.xlane.xlu1 %971 }
 0x507   :  { %v977_v44 = vmul.f32 0.03125, %v972_v43 }
 0x508   :  { %v980_v45 = vsub.f32 %v969_v34, %v978_v42 }
 0x509   :  { %v979_v46 = vsub.f32 %v968_v36, %v977_v44 }
 0x50a   :  { %v982_v49 = vmul.f32 %v980_v45, %v980_v45 }
 0x50b   :  { %v981_v47 = vmul.f32 %v979_v46, %v979_v46 }
 0x50c   :  { %v986_v50 = vsel %vm48_vm1, %v982_v49, 0.0 }
 0x50d   :  { %v983_v48 = vsel %vm48_vm1, %v981_v47, 0.0  ;;  %v1113_v47 = vsub.s32 4, %v1830_v41 }
 0x50e   :  { %984 = vadd.xlane.f32.xlu1 %v983_v48 }
 0x50f   :  { %v1114_v48 = vrot.slane %v1836_v31, %v1113_v47 }
 0x512   :  { %987 = vadd.xlane.f32.xlu1 %v986_v50 }
 0x59b   :  { %v985_v53 = vpop.xlane.xlu1 %984 }
 0x59c   :  { %v989_v54 = vmul.f32 0.03125, %v985_v53 }
 0x59e   :  { %v991_v55 = vadd.f32 1e-05, %v989_v54 }
 0x59f   :  { %v988_v56 = vpop.xlane.xlu1 %987 }
 0x5a0   :  { %1594 = vrsqrt.f32 %v991_v55  ;;  %v990_v57 = vmul.f32 0.03125, %v988_v56 }
 0x5a2   :  { %v992_v58 = vadd.f32 1e-05, %v990_v57 }
 0x5a4   :  { %1596 = vrsqrt.f32 %v992_v58 }
 0x5aa   :  { %v1595_v62 = vpop.eup %1594 }
 0x5ab   :  { %v995_v63 = vmul.f32 %v1595_v62, %v979_v46 }
 0x5ad   :  { %v1001_v0 = vmul.f32 %v1000_v60, %v995_v63 }
 0x5ae   :  { %v1597_v5 = vpop.eup %1596 }
 0x5af   :  { %v996_v40 = vmul.f32 %v1597_v5, %v980_v45  ;;  %v1007_v7 = vadd.f32 %v1006_v2, %v1001_v0 }
 0x5b1   :  { %v1002_v6 = vmul.f32 %v1000_v60, %v996_v40  ;;  %v1856_v9 = vadd.f32 %v1007_v7, %v1696_v3  ;;  %v1555_v3 = vld [vmem:[%s1930_s5 + $0x8] sm:$0xff]  }
 0x5b3   :  { %v1008_v8 = vadd.f32 %v1006_v2, %v1002_v6 }
 0x5b5   :  { %v1859_v10 = vadd.f32 %v1008_v8, %v1701_v4  ;;  %v1556_v4 = vld [vmem:[%s1930_s5 + $0x10] sm:$0xff]   ;;  %s1641_s5 = smov [#allocation2]  }
 0x5b6   :  { %s1251_s28 = sshll.u32 %s1641_s5, 4  ;;  %s1252_s28 = int_to_ptr.vmem [resolvable:$true] %s1251_s28 }
 0x5b7   :  { %v1011_v11 = vpack.c.bf16 %v1859_v10, %v1856_v9  ;;  %s1606_s29 = scalar_lea.vmem %s1252_s28, 256  ;;  %p1611_p1 = scmp.lt.s32.totalorder %s1252_s28, %s1252_s28 }
 0x5b8   :  { %p1607_p0 = scmp.ne.s32.totalorder %s1252_s28, %s1606_s29  ;;  %p1612_p2 = scmp.lt.s32.totalorder %s1606_s29, %s1606_s29 }
 0x5b9   :  { %1430 = vmatmul.mubr.msk.bf16.vlgmr.msra.gmra.mrb[4].mxu1 %vm48_vm1, %v1011_v11 }
 0x5ba   :  { %1449 = vmatprep.mubr.msk.bf16.mxu1 %vm1631_vm0, %v1630_v1  ;;  %1434 = vmatpush3.bf16.msra.mxu1 %v1554_v12  ;;  %p1613_p3 = por %p1612_p2, %p1611_p1 }
 0x5bb   :  { %1435 = vmatprep.subr.bf16.mxu1 %v1630_v1 }
 0x5bc   :  { %p1614_p4 = pnand %p1613_p3, %p1607_p0 }
 0x5be   :  { %1436 = vmatpush3.bf16.msra.mxu1 %v1555_v3  ;;  %v1232_v3 = vsub.s32 5, %v1830_v41 }
 0x5bf   :  { %1437 = vmatprep.subr.bf16.mxu1 %v1630_v1 }
 0x5c2   :  { %1438 = vmatpush3.bf16.msra.mxu1 %v1556_v4  ;;  %v1238_v4 = vsub.s32 6, %v1830_v41 }
 0x5c3   :  { %1439 = vmatprep.subr.bf16.mxu1 %v1630_v1 }
 0x5c6   :  { %1440 = vmatpush3.bf16.msra.mxu1 %v1557_v13  ;;  %v1233_v13 = vrot.slane %v1836_v31, %v1232_v3 }
 0x5c7   :  { %1441 = vmatprep.subr.bf16.mxu1 %v1630_v1 }
 0x5ca   :  { %1442 = vmatpush3.bf16.msra.mxu1 %v1558_v14 }
 0x5cb   :  { %1443 = vmatprep.subr.bf16.mxu1 %v1630_v1 }
 0x5ce   :  { %1444 = vmatpush3.bf16.msra.mxu1 %v1559_v15 }
 0x5cf   :  { %1445 = vmatprep.subr.bf16.mxu1 %v1630_v1 }
 0x5d2   :  { %1446 = vmatpush3.bf16.msra.mxu1 %v1560_v16  ;;  %v1239_v16 = vrot.slane %v1836_v31, %v1238_v4 }
 0x5d3   :  { %1447 = vmatprep.subr.bf16.mxu1 %v1630_v1 }
 0x5d6   :  { %1448 = vmatpush3.bf16.msra.mxu1 %v1561_v17 }
 0x68c   :  { %v1069_v20 = vpop.f32.mrb[4].mxu1 }
 0x68d   :  { %v1070_v21 = vadd.f32 %v1069_v20, %v1019_v19  ;;  %v1431_v22 = vpop.f32.mrb[5].mxu1 }
 0x68e   :  { %v1072_v23 = vpop.f32.mrb[6].mxu1 }
 0x68f   :  { %v1076_v24 = vmul.f32 %v1070_v21, %v1070_v21  ;;  %v1073_v25 = vadd.f32 %v1072_v23, %v1019_v19  ;;  %v1432_v26 = vpop.f32.mrb[7].mxu1 }
 0x691   :  { %v1078_v27 = vmul.f32 %v1076_v24, %v1070_v21  ;;  %v1077_v28 = vmul.f32 %v1073_v25, %v1073_v25 }
 0x693   :  { %v1080_v29 = vmul.f32 0.044715, %v1078_v27  ;;  %v1079_v1 = vmul.f32 %v1077_v28, %v1073_v25 }
 0x695   :  { %v1082_v30 = vadd.f32 %v1080_v29, %v1070_v21  ;;  %v1081_v32 = vmul.f32 0.044715, %v1079_v1 }
 0x697   :  { %v1084_v33 = vmul.f32 0.7978846, %v1082_v30  ;;  %v1083_v34 = vadd.f32 %v1081_v32, %v1073_v25 }
 0x699   :  { %1598 = vtanh.f32 %v1084_v33  ;;  %v1085_v35 = vmul.f32 0.7978846, %v1083_v34 }
 0x69b   :  { %1600 = vtanh.f32 %v1085_v35 }
 0x6a3   :  { %v1599_v36 = vpop.eup %1598 }
 0x6a4   :  { %v1088_v37 = vadd.f32 1.0, %v1599_v36 }
 0x6a5   :  { %v1601_v38 = vpop.eup %1600 }
 0x6a6   :  { %v1090_v39 = vmul.f32 0.5, %v1088_v37  ;;  %v1089_v42 = vadd.f32 1.0, %v1601_v38 }
 0x6a8   :  { %v1091_v43 = vmul.f32 0.5, %v1089_v42  ;;  %v1092_v44 = vmul.f32 %v1090_v39, %v1070_v21 }
 0x6aa   :  { %v1093_v45 = vmul.f32 %v1091_v43, %v1073_v25 }
 0x6ac   :  { %v1094_v46 = vpack.c.bf16 %v1093_v45, %v1092_v44 }
 0x6ae   :  { %1450 = vmatmul.mubr.bf16.vlgmr.msra.gmra.mrb[8].mxu1 %v1094_v46 }
 0x781   :  { %v1197_v49 = vpop.f32.mrb[8].mxu1 }
 0x782   :  { %v1198_v50 = vadd.f32 %v1197_v49, %v1114_v48  ;;  %v1451_v51 = vpop.f32.mrb[9].mxu1 }
 0x783   :  { %v1200_v52 = vpop.f32.mrb[10].mxu1 }
 0x784   :  { %v1201_v53 = vadd.f32 %v1200_v52, %v1114_v48  ;;  %v1452_v54 = vpop.f32.mrb[11].mxu1  ;;  %v1204_v55 = vsel %vm48_vm1, %v1198_v50, 0.0 }
 0x785   :  { %1205 = vadd.xlane.f32.xlu0 %v1204_v55 }
 0x786   :  { %v1207_v56 = vsel %vm48_vm1, %v1201_v53, 0.0 }
 0x787   :  { %1208 = vadd.xlane.f32.xlu1 %v1207_v56 }
 0x812   :  { %v1206_v57 = vpop.xlane.xlu0 %1205 }
 0x813   :  { %v1210_v58 = vmul.f32 0.03125, %v1206_v57 }
 0x814   :  { %v1209_v59 = vpop.xlane.xlu1 %1208 }
 0x815   :  { %v1212_v60 = vsub.f32 %v1198_v50, %v1210_v58  ;;  %v1211_v61 = vmul.f32 0.03125, %v1209_v59 }
 0x817   :  { %v1213_v62 = vsub.f32 %v1201_v53, %v1211_v61  ;;  %v1214_v63 = vmul.f32 %v1212_v60, %v1212_v60 }
 0x819   :  { %v1216_v0 = vsel %vm48_vm1, %v1214_v63, 0.0  ;;  %v1215_v2 = vmul.f32 %v1213_v62, %v1213_v62 }
 0x81a   :  { %1217 = vadd.xlane.f32.xlu0 %v1216_v0 }
 0x81b   :  { %v1219_v5 = vsel %vm48_vm1, %v1215_v2, 0.0 }
 0x81c   :  { %1220 = vadd.xlane.f32.xlu1 %v1219_v5 }
 0x8a7   :  { %v1218_v40 = vpop.xlane.xlu0 %1217 }
 0x8a8   :  { %v1222_v6 = vmul.f32 0.03125, %v1218_v40 }
 0x8a9   :  { %v1221_v7 = vpop.xlane.xlu1 %1220 }
 0x8aa   :  { %v1224_v8 = vadd.f32 1e-05, %v1222_v6  ;;  %v1223_v11 = vmul.f32 0.03125, %v1221_v7 }
 0x8ac   :  { %1602 = vrsqrt.f32 %v1224_v8  ;;  %v1225_v12 = vadd.f32 1e-05, %v1223_v11 }
 0x8ae   :  { %1604 = vrsqrt.f32 %v1225_v12 }
 0x8b6   :  { %v1603_v14 = vpop.eup %1602 }
 0x8b7   :  { %v1228_v15 = vmul.f32 %v1603_v14, %v1212_v60 }
 0x8b8   :  { %v1605_v17 = vpop.eup %1604 }
 0x8b9   :  { %v1234_v18 = vmul.f32 %v1233_v13, %v1228_v15  ;;  %v1229_v19 = vmul.f32 %v1605_v17, %v1213_v62 }
 0x8bb   :  { %v1235_v20 = vmul.f32 %v1233_v13, %v1229_v19  ;;  %v1240_v21 = vadd.f32 %v1239_v16, %v1234_v18 }
 0x8bd   :  { %v1241_v22 = vadd.f32 %v1239_v16, %v1235_v20  ;;  %v1242_v23 = vadd.f32 %v1240_v21, %v1856_v9 }
 0x8bf   :  { %v1243_v24 = vadd.f32 %v1241_v22, %v1859_v10  ;;  %1244 = vst.msk [vmem:[#allocation2] sm:$0xff] %vm48_vm1, %v1242_v23 }
 0x8c1   :  { %1245 = vst.msk [vmem:[#allocation2 + $0x8] sm:$0xff] %vm48_vm1, %v1243_v24 }
 0x8c2   :  { %1617 = shalt.err (!%p1614_p4)
}
 0x8c3   :  { %s1618_s9 = scalar_lea.hbm %s1932_s7, 256 }
 0x8c4   :  { %p1619_p5 = scmp.ne.s32.totalorder %s1932_s7, %s1618_s9  ;;  %p1622_p6 = scmp.lt.u32.totalorder %s1618_s9, %s1932_s7 }
 0x8c6   :  { %p1624_p7 = pnand %p1622_p6, %p1619_p5 }
 0x8c8   :  { %1627 = shalt.err (!%p1624_p7)
}
 0x8c9   :  { %s1642_s6 = smov 128   ;;  %s1643_s0 = smov 8  }
 0x8ca   :  { %1257 = dma.vmem_to_hbm [thread:$0]  %s1252_s28, 256, %s1932_s7, [#allocation3], %s1642_s6, %s1642_s6, %s1643_s0  }
 0x8cb   :  { %1628 = dma.done.wait [#allocation3], 256  }
 0x8cc   :  { %1629 = vsyncadd [#allocation3], 4294967040 }
 0x8cd   :  { %1261 = vsyncpa [#allocation3], 1 }

</bundles_post_ra>
